<compile_context>
chip_gen: v7x
topology: tpu7x:2x2x1
jax: 0.10.0
libtpu: 0.0.40
codegen_flags: <defaults>
</compile_context>

<pallas_src>
import functools

import jax
import jax.numpy as jnp
from jax import lax
from jax.experimental import pallas as pl
from jax.experimental.pallas import tpu as pltpu
from jax.scipy.linalg import block_diag


def _round_up(n, m):
    return ((n + m - 1) // m) * m


# ---------------------------------------------------------------------------
# in-kernel math helpers (pure jnp, lowered inside the Pallas body)
# ---------------------------------------------------------------------------
def _softplus(x):
    # numerically-stable softplus = max(x,0) + log1p(exp(-|x|))
    return jnp.maximum(x, 0.0) + jnp.log1p(jnp.exp(-jnp.abs(x)))


def _swish(x):
    # Exact, numerically-stable swish: sigmoid via exp(-|x|) (never overflows).
    # Reciprocal goes to the EUP (its own VLIW slot); exact, not approx.
    z = jnp.exp(-jnp.abs(x))
    r = pl.reciprocal(1.0 + z)
    sig = jnp.where(x >= 0.0, r, z * r)
    return x * sig


# ---------------------------------------------------------------------------
# Pallas kernel: one batch tile per grid step, 3 fused lane-dense matmuls
# ---------------------------------------------------------------------------
def _fused_ensemble_kernel(
    x_ref,       # (TB, Din)
    w1_ref,      # (Din, E*H1)      concat over ensemble
    b1_ref,      # (1, E*H1)
    w2_ref,      # (E*H1, E*H2)     block-diag, dropout m1 folded in
    b2_ref,      # (1, E*H2)
    wh_ref,      # (E*H2, NOUT)     block-diag heads: [mean | logvar | pad]
    bh_ref,      # (1, NOUT)
    minlv_ref,   # (1, NOUT)        soft_clamp bounds on logvar lanes
    maxlv_ref,   # (1, NOUT)
    out_ref,     # (TB, NOUT)       packed lane-dense output
    *,
    eod,         # E * OD  (static)
):
    mm_dtype = w1_ref.dtype
    x = x_ref[...].astype(mm_dtype)

    # backbone layer 1: EnsembleLinear -> Swish   (one (TB,Din)@(Din,E*H1) matmul)
    h = jnp.dot(x, w1_ref[...], preferred_element_type=jnp.float32) + b1_ref[...]
    h = _swish(h)

    # backbone layer 2 (block-diag, m1 folded): (TB,E*H1)@(E*H1,E*H2)
    h = jnp.dot(h.astype(mm_dtype), w2_ref[...],
                preferred_element_type=jnp.float32) + b2_ref[...]
    h = _swish(h)

    # fused output head (block-diag mean | block-diag logvar | zero pad)
    out = jnp.dot(h.astype(mm_dtype), wh_ref[...],
                  preferred_element_type=jnp.float32) + bh_ref[...]

    # soft_clamp(logvar, min_logvar, max_logvar) on the logvar lanes only.
    maxlv = maxlv_ref[...]
    minlv = minlv_ref[...]
    lv = maxlv - _softplus(maxlv - out)
    lv = minlv + _softplus(lv - minlv)
    col = lax.broadcasted_iota(jnp.int32, out.shape, 1)
    is_lv = (col >= eod) & (col < 2 * eod)
    out = jnp.where(is_lv, lv, out)

    out_ref[...] = out.astype(out_ref.dtype)


# ---------------------------------------------------------------------------
# wrapper building the pallas_call
# ---------------------------------------------------------------------------
def ensemble_dynamics_forward(obs_action, params, train=True,
                              matmul_dtype=jnp.bfloat16,
                              out_dtype=jnp.float32,
                              tile_batch=512):
    """obs_action: (B, obs_dim+action_dim) float32.

    Returns (mean, logvar), each (num_ensemble, B, obs_dim + 1).
    """
    x = jnp.asarray(obs_action, jnp.float32)
    B, Din = x.shape
    w1, b1, m1 = params["w1"], params["b1"], params["m1"]
    w2, b2, m2 = params["w2"], params["b2"], params["m2"]
    wo, bo = params["wo"], params["bo"]
    min_lv, max_lv = params["min_logvar"], params["max_logvar"]

    if not train:
        m1 = jnp.ones_like(m1)
        m2 = jnp.ones_like(m2)

    E, _, H1 = w1.shape
    H2 = w2.shape[-1]
    OD = wo.shape[-1] // 2
    EOD = E * OD
    NOUT = _round_up(2 * EOD, 128)   # lane-dense packed output width

    # --- one-time wrapper-side weight prep ---------------------------------
    # layer 1: x is shared across the ensemble -> concat along N: (Din, E*H1)
    w1c = jnp.transpose(w1, (1, 0, 2)).reshape(Din, E * H1)
    b1c = jnp.reshape(b1, (1, E * H1))
    # layer 2: dropout mask m1 folded in, block-diagonal -> (E*H1, E*H2)
    #   (swish(h) * m1) @ w2 == swish(h) @ (m1[:, None] * w2)
    w2f = w2 * m1[None, :, None]
    w2bd = block_diag(*[w2f[e] for e in range(E)])
    b2c = jnp.reshape(b2, (1, E * H2))
    # output head: m2 folded in; [mean block-diag | logvar block-diag | zero pad]
    wof = wo * m2[None, :, None]
    wm_bd = block_diag(*[wof[e, :, :OD] for e in range(E)])
    wl_bd = block_diag(*[wof[e, :, OD:] for e in range(E)])
    wh = jnp.concatenate([wm_bd, wl_bd], axis=1)
    wh = jnp.pad(wh, ((0, 0), (0, NOUT - 2 * EOD)))
    bh = jnp.concatenate([jnp.reshape(bo[..., :OD], (EOD,)),
                          jnp.reshape(bo[..., OD:], (EOD,))])
    bh = jnp.pad(bh, (0, NOUT - 2 * EOD)).reshape(1, NOUT)
    # soft_clamp bounds placed on the logvar lanes of the packed output
    minlv = jnp.zeros((NOUT,), jnp.float32)
    minlv = minlv.at[EOD:2 * EOD].set(jnp.tile(min_lv, E)).reshape(1, NOUT)
    maxlv = jnp.zeros((NOUT,), jnp.float32)
    maxlv = maxlv.at[EOD:2 * EOD].set(jnp.tile(max_lv, E)).reshape(1, NOUT)

    # matmul operands (weights) pre-cast once; biases / elementwise stay f32.
    w1c = w1c.astype(matmul_dtype)
    w2bd = w2bd.astype(matmul_dtype)
    wh = wh.astype(matmul_dtype)

    # --- batch tiling --------------------------------------------------------
    # TODO(synk): on v7x (64 MiB VMEM) consider halving tile_batch at very large
    # hidden widths; at these shapes the footprint is tiny either way.
    TB = min(tile_batch, _round_up(B, 8))
    B_pad = _round_up(B, TB)
    if B_pad != B:
        x = jnp.pad(x, ((0, B_pad - B), (0, 0)))
    grid = (B_pad // TB,)

    def batch_spec(shape):
        return pl.BlockSpec(shape, lambda i: (i, 0))

    def const_spec(shape):
        return pl.BlockSpec(shape, lambda i: (0, 0))   # stays VMEM-resident

    kernel = functools.partial(_fused_ensemble_kernel, eod=EOD)
    fn = pl.pallas_call(
        kernel,
        out_shape=jax.ShapeDtypeStruct((B_pad, NOUT), out_dtype),
        grid=grid,
        in_specs=[
            batch_spec((TB, Din)),
            const_spec((Din, E * H1)), const_spec((1, E * H1)),
            const_spec((E * H1, E * H2)), const_spec((1, E * H2)),
            const_spec((E * H2, NOUT)), const_spec((1, NOUT)),
            const_spec((1, NOUT)), const_spec((1, NOUT)),
        ],
        out_specs=batch_spec((TB, NOUT)),
        compiler_params=pltpu.CompilerParams(
            dimension_semantics=("parallel",),
            vmem_limit_bytes=32 * 1024 * 1024),
    )
    packed = fn(x, w1c, b1c, w2bd, b2c, wh, bh, minlv, maxlv)

    # unpack the lane-dense result wrapper-side
    packed = packed[:B].astype(jnp.float32)
    mean = packed[:, :EOD].reshape(B, E, OD).transpose(1, 0, 2)
    logvar = packed[:, EOD:2 * EOD].reshape(B, E, OD).transpose(1, 0, 2)
    return mean, logvar


# ---------------------------------------------------------------------------
# pure-JAX reference (mirrors the PyTorch forward) for a correctness check
# ---------------------------------------------------------------------------
def _reference_forward(obs_action, params, matmul_dtype=jnp.float32):
    x = jnp.asarray(obs_action, jnp.float32)
    if jnp.dtype(matmul_dtype) == jnp.dtype(jnp.float32):
        prec = jax.lax.Precision.HIGHEST
    else:
        prec = None

    def mm(a, b, eq):
        return jnp.einsum(eq, a.astype(matmul_dtype), b.astype(matmul_dtype),
                          preferred_element_type=jnp.float32, precision=prec)

    h = mm(x, params["w1"], "bi,eio->ebo") + params["b1"]
    h = h * jax.nn.sigmoid(h) * params["m1"]
    h = mm(h, params["w2"], "ebi,eio->ebo") + params["b2"]
    h = h * jax.nn.sigmoid(h) * params["m2"]
    out = mm(h, params["wo"], "ebi,eio->ebo") + params["bo"]
    od = params["min_logvar"].shape[0]
    mean, logvar = out[..., :od], out[..., od:]
    logvar = params["max_logvar"] - jax.nn.softplus(params["max_logvar"] - logvar)
    logvar = params["min_logvar"] + jax.nn.softplus(logvar - params["min_logvar"])
    return mean, logvar


# ---------------------------------------------------------------------------
# deterministic parameter construction (shapes from EnsembleDynamicsModel.__init__)
# ---------------------------------------------------------------------------
def make_params(key, obs_dim, action_dim, hidden_dims, num_ensemble,
                with_reward=True):
    assert len(hidden_dims) == 2, "this synthetic kernel instantiates 2 backbone layers"
    din = obs_dim + action_dim
    h1, h2 = hidden_dims
    od = obs_dim + int(with_reward)
    ks = jax.random.split(key, 8)
    # Non-trivial (but deterministic) dropout masks so the mask-folding path is
    # actually exercised by the correctness check.
    keep = 0.9
    m1 = jax.random.bernoulli(ks[6], keep, (h1,)).astype(jnp.float32) / keep
    m2 = jax.random.bernoulli(ks[7], keep, (h2,)).astype(jnp.float32) / keep
    params = {
        "w1": 0.1 * jax.random.normal(ks[0], (num_ensemble, din, h1), jnp.float32),
        "b1": 0.01 * jax.random.normal(ks[1], (num_ensemble, 1, h1), jnp.float32),
        "m1": m1,
        "w2": 0.1 * jax.random.normal(ks[2], (num_ensemble, h1, h2), jnp.float32),
        "b2": 0.01 * jax.random.normal(ks[3], (num_ensemble, 1, h2), jnp.float32),
        "m2": m2,
        "wo": 0.1 * jax.random.normal(ks[4], (num_ensemble, h2, 2 * od), jnp.float32),
        "bo": 0.01 * jax.random.normal(ks[5], (num_ensemble, 1, 2 * od), jnp.float32),
        "min_logvar": jnp.full((od,), -10.0, jnp.float32),
        "max_logvar": jnp.full((od,), 0.5, jnp.float32),
    }
    return params


if __name__ == "__main__":
    obs_dim, action_dim = 11, 3
    hidden_dims = (32, 32)
    num_ensemble = 7
    batch = 8

    key = jax.random.PRNGKey(0)
    kp, kx = jax.random.split(key)
    params = make_params(kp, obs_dim, action_dim, hidden_dims, num_ensemble)
    obs_action = jax.random.normal(kx, (batch, obs_dim + action_dim), jnp.float32)

    # f32 matmul path vs f32 reference — tight tolerance (exact swish, no
    # approximate reciprocal anymore).
    ref_mean, ref_logvar = _reference_forward(obs_action, params, jnp.float32)
    mean, logvar = ensemble_dynamics_forward(
        obs_action, params, train=True, matmul_dtype=jnp.float32)
    mean = jax.block_until_ready(mean)
    logvar = jax.block_until_ready(logvar)
    assert mean.shape == (num_ensemble, batch, obs_dim + 1)
    assert logvar.shape == (num_ensemble, batch, obs_dim + 1)
    assert jnp.allclose(mean, ref_mean, atol=5e-3, rtol=5e-3)
    assert jnp.allclose(logvar, ref_logvar, atol=5e-3, rtol=5e-3)

    # bf16 matmul-operand path (the default / production setting) validated
    # against a bf16-operand JAX reference, not the f32 one.
    ref_mean_bf, ref_logvar_bf = _reference_forward(obs_action, params, jnp.bfloat16)
    mean_bf, logvar_bf = ensemble_dynamics_forward(obs_action, params, train=True)
    mean_bf = jax.block_until_ready(mean_bf)
    logvar_bf = jax.block_until_ready(logvar_bf)
    assert jnp.all(jnp.isfinite(mean_bf)) and jnp.all(jnp.isfinite(logvar_bf))
    assert jnp.allclose(mean_bf, ref_mean_bf, atol=5e-2, rtol=5e-2)
    assert jnp.allclose(logvar_bf, ref_logvar_bf, atol=5e-2, rtol=5e-2)

    print("KERNEL_OK")
</pallas_src>

<mosaic_0001>
module attributes {stable_mosaic.version = 11 : i64} {
  func.func @_fused_ensemble_kernel(%arg0: i32, %arg1: memref<8x14xf32, #tpu.memory_space<vmem>>, %arg2: memref<14x224xf32, #tpu.memory_space<vmem>>, %arg3: memref<1x224xf32, #tpu.memory_space<vmem>>, %arg4: memref<224x224xf32, #tpu.memory_space<vmem>>, %arg5: memref<1x224xf32, #tpu.memory_space<vmem>>, %arg6: memref<224x256xf32, #tpu.memory_space<vmem>>, %arg7: memref<1x256xf32, #tpu.memory_space<vmem>>, %arg8: memref<1x256xf32, #tpu.memory_space<vmem>>, %arg9: memref<1x256xf32, #tpu.memory_space<vmem>>, %arg10: memref<8x256xf32, #tpu.memory_space<vmem>>) attributes {dimension_semantics = [#tpu.dimension_semantics<parallel>], iteration_bounds = array<i64: 1>, scalar_prefetch = 0 : i64, scratch_operands = 0 : i64, tpu.core_type = #tpu.core_type<tc>, window_params = [{transform_indices = @transform_0, window_bounds = array<i64: 8, 14>}, {pipeline_mode = #tpu.pipeline_mode<synchronous>, transform_indices = @transform_1, window_bounds = array<i64: 14, 224>}, {pipeline_mode = #tpu.pipeline_mode<synchronous>, transform_indices = @transform_2, window_bounds = array<i64: 1, 224>}, {pipeline_mode = #tpu.pipeline_mode<synchronous>, transform_indices = @transform_3, window_bounds = array<i64: 224, 224>}, {pipeline_mode = #tpu.pipeline_mode<synchronous>, transform_indices = @transform_4, window_bounds = array<i64: 1, 224>}, {pipeline_mode = #tpu.pipeline_mode<synchronous>, transform_indices = @transform_5, window_bounds = array<i64: 224, 256>}, {pipeline_mode = #tpu.pipeline_mode<synchronous>, transform_indices = @transform_6, window_bounds = array<i64: 1, 256>}, {pipeline_mode = #tpu.pipeline_mode<synchronous>, transform_indices = @transform_7, window_bounds = array<i64: 1, 256>}, {pipeline_mode = #tpu.pipeline_mode<synchronous>, transform_indices = @transform_8, window_bounds = array<i64: 1, 256>}, {transform_indices = @transform_9, window_bounds = array<i64: 8, 256>}]} {
    %c0 = arith.constant 0 : index
    %c0_0 = arith.constant 0 : index
    %0 = vector.load %arg1[%c0, %c0_0] : memref<8x14xf32, #tpu.memory_space<vmem>>, vector<8x14xf32>
    %c0_1 = arith.constant 0 : index
    %c0_2 = arith.constant 0 : index
    %1 = vector.load %arg2[%c0_1, %c0_2] : memref<14x224xf32, #tpu.memory_space<vmem>>, vector<14x224xf32>
    %cst = arith.constant dense<0.000000e+00> : vector<8x224xf32>
    %2 = tpu.matmul %0, %1, %cst {dimension_numbers = #tpu.dot_dimension_numbers<[1], [0], [0], [1], [0, 0, 1, 1], [], []>} : vector<8x14xf32>, vector<14x224xf32>, vector<8x224xf32> -> vector<8x224xf32>
    %c0_3 = arith.constant 0 : index
    %c0_4 = arith.constant 0 : index
    %3 = vector.load %arg3[%c0_3, %c0_4] : memref<1x224xf32, #tpu.memory_space<vmem>>, vector<1x224xf32>
    %4 = vector.broadcast %3 : vector<1x224xf32> to vector<8x224xf32>
    %5 = arith.addf %2, %4 : vector<8x224xf32>
    %6 = math.absf %5 : vector<8x224xf32>
    %cst_5 = arith.constant 0.000000e+00 : f32
    %7 = vector.broadcast %cst_5 : f32 to vector<8x224xf32>
    %8 = arith.subf %7, %6 : vector<8x224xf32>
    %9 = math.exp %8 : vector<8x224xf32>
    %cst_6 = arith.constant 1.000000e+00 : f32
    %10 = vector.broadcast %cst_6 : f32 to vector<8x224xf32>
    %11 = arith.addf %10, %9 : vector<8x224xf32>
    %12 = tpu.reciprocal %11 : vector<8x224xf32> -> vector<8x224xf32>
    %cst_7 = arith.constant 0.000000e+00 : f32
    %13 = vector.broadcast %cst_7 : f32 to vector<8x224xf32>
    %14 = arith.cmpf oge, %5, %13 : vector<8x224xf32>
    %15 = arith.mulf %9, %12 : vector<8x224xf32>
    %16 = arith.select %14, %12, %15 : vector<8x224xi1>, vector<8x224xf32>
    %17 = arith.mulf %5, %16 : vector<8x224xf32>
    %c0_8 = arith.constant 0 : index
    %c0_9 = arith.constant 0 : index
    %18 = vector.load %arg4[%c0_8, %c0_9] : memref<224x224xf32, #tpu.memory_space<vmem>>, vector<224x224xf32>
    %cst_10 = arith.constant dense<0.000000e+00> : vector<8x224xf32>
    %19 = tpu.matmul %17, %18, %cst_10 {dimension_numbers = #tpu.dot_dimension_numbers<[1], [0], [0], [1], [0, 0, 1, 1], [], []>} : vector<8x224xf32>, vector<224x224xf32>, vector<8x224xf32> -> vector<8x224xf32>
    %c0_11 = arith.constant 0 : index
    %c0_12 = arith.constant 0 : index
    %20 = vector.load %arg5[%c0_11, %c0_12] : memref<1x224xf32, #tpu.memory_space<vmem>>, vector<1x224xf32>
    %21 = vector.broadcast %20 : vector<1x224xf32> to vector<8x224xf32>
    %22 = arith.addf %19, %21 : vector<8x224xf32>
    %23 = math.absf %22 : vector<8x224xf32>
    %cst_13 = arith.constant 0.000000e+00 : f32
    %24 = vector.broadcast %cst_13 : f32 to vector<8x224xf32>
    %25 = arith.subf %24, %23 : vector<8x224xf32>
    %26 = math.exp %25 : vector<8x224xf32>
    %cst_14 = arith.constant 1.000000e+00 : f32
    %27 = vector.broadcast %cst_14 : f32 to vector<8x224xf32>
    %28 = arith.addf %27, %26 : vector<8x224xf32>
    %29 = tpu.reciprocal %28 : vector<8x224xf32> -> vector<8x224xf32>
    %cst_15 = arith.constant 0.000000e+00 : f32
    %30 = vector.broadcast %cst_15 : f32 to vector<8x224xf32>
    %31 = arith.cmpf oge, %22, %30 : vector<8x224xf32>
    %32 = arith.mulf %26, %29 : vector<8x224xf32>
    %33 = arith.select %31, %29, %32 : vector<8x224xi1>, vector<8x224xf32>
    %34 = arith.mulf %22, %33 : vector<8x224xf32>
    %c0_16 = arith.constant 0 : index
    %c0_17 = arith.constant 0 : index
    %35 = vector.load %arg6[%c0_16, %c0_17] : memref<224x256xf32, #tpu.memory_space<vmem>>, vector<224x256xf32>
    %cst_18 = arith.constant dense<0.000000e+00> : vector<8x256xf32>
    %36 = tpu.matmul %34, %35, %cst_18 {dimension_numbers = #tpu.dot_dimension_numbers<[1], [0], [0], [1], [0, 0, 1, 1], [], []>} : vector<8x224xf32>, vector<224x256xf32>, vector<8x256xf32> -> vector<8x256xf32>
    %c0_19 = arith.constant 0 : index
    %c0_20 = arith.constant 0 : index
    %37 = vector.load %arg7[%c0_19, %c0_20] : memref<1x256xf32, #tpu.memory_space<vmem>>, vector<1x256xf32>
    %38 = vector.broadcast %37 : vector<1x256xf32> to vector<8x256xf32>
    %39 = arith.addf %36, %38 : vector<8x256xf32>
    %c0_21 = arith.constant 0 : index
    %c0_22 = arith.constant 0 : index
    %40 = vector.load %arg9[%c0_21, %c0_22] : memref<1x256xf32, #tpu.memory_space<vmem>>, vector<1x256xf32>
    %c0_23 = arith.constant 0 : index
    %c0_24 = arith.constant 0 : index
    %41 = vector.load %arg8[%c0_23, %c0_24] : memref<1x256xf32, #tpu.memory_space<vmem>>, vector<1x256xf32>
    %42 = vector.broadcast %40 : vector<1x256xf32> to vector<8x256xf32>
    %43 = arith.subf %42, %39 : vector<8x256xf32>
    %cst_25 = arith.constant 0.000000e+00 : f32
    %44 = vector.broadcast %cst_25 : f32 to vector<8x256xf32>
    %45 = arith.maximumf %43, %44 : vector<8x256xf32>
    %46 = math.absf %43 : vector<8x256xf32>
    %cst_26 = arith.constant 0.000000e+00 : f32
    %47 = vector.broadcast %cst_26 : f32 to vector<8x256xf32>
    %48 = arith.subf %47, %46 : vector<8x256xf32>
    %49 = math.exp %48 : vector<8x256xf32>
    %50 = math.log1p %49 : vector<8x256xf32>
    %51 = arith.addf %45, %50 : vector<8x256xf32>
    %52 = vector.broadcast %40 : vector<1x256xf32> to vector<8x256xf32>
    %53 = arith.subf %52, %51 : vector<8x256xf32>
    %54 = vector.broadcast %41 : vector<1x256xf32> to vector<8x256xf32>
    %55 = arith.subf %53, %54 : vector<8x256xf32>
    %cst_27 = arith.constant 0.000000e+00 : f32
    %56 = vector.broadcast %cst_27 : f32 to vector<8x256xf32>
    %57 = arith.maximumf %55, %56 : vector<8x256xf32>
    %58 = math.absf %55 : vector<8x256xf32>
    %cst_28 = arith.constant 0.000000e+00 : f32
    %59 = vector.broadcast %cst_28 : f32 to vector<8x256xf32>
    %60 = arith.subf %59, %58 : vector<8x256xf32>
    %61 = math.exp %60 : vector<8x256xf32>
    %62 = math.log1p %61 : vector<8x256xf32>
    %63 = arith.addf %57, %62 : vector<8x256xf32>
    %64 = vector.broadcast %41 : vector<1x256xf32> to vector<8x256xf32>
    %65 = arith.addf %64, %63 : vector<8x256xf32>
    %66 = tpu.iota {dimensions = array<i32: 1>} : vector<8x256xi32>
    %c84_i32 = arith.constant 84 : i32
    %67 = vector.broadcast %c84_i32 : i32 to vector<8x256xi32>
    %68 = arith.cmpi sge, %66, %67 : vector<8x256xi32>
    %c168_i32 = arith.constant 168 : i32
    %69 = vector.broadcast %c168_i32 : i32 to vector<8x256xi32>
    %70 = arith.cmpi slt, %66, %69 : vector<8x256xi32>
    %71 = arith.andi %68, %70 : vector<8x256xi1>
    %72 = arith.select %71, %65, %39 : vector<8x256xi1>, vector<8x256xf32>
    %c0_29 = arith.constant 0 : index
    %c0_30 = arith.constant 0 : index
    %73 = vector.load %arg10[%c0_29, %c0_30] : memref<8x256xf32, #tpu.memory_space<vmem>>, vector<8x256xf32>
    tpu.vector_store %arg10[%c0_29, %c0_30], %72 {strides = array<i32>} : memref<8x256xf32, #tpu.memory_space<vmem>>, vector<8x256xf32>,
    return
  }
  func.func @transform_0(%arg0: i32) -> (i32, i32) {
    %c0_i32 = arith.constant 0 : i32
    %c0_i32_0 = arith.constant 0 : i32
    return %arg0, %c0_i32 : i32, i32
  }
  func.func @transform_1(%arg0: i32) -> (i32, i32) {
    %c0_i32 = arith.constant 0 : i32
    %c0_i32_0 = arith.constant 0 : i32
    %c0_i32_1 = arith.constant 0 : i32
    return %c0_i32, %c0_i32_0 : i32, i32
  }
  func.func @transform_2(%arg0: i32) -> (i32, i32) {
    %c0_i32 = arith.constant 0 : i32
    %c0_i32_0 = arith.constant 0 : i32
    %c0_i32_1 = arith.constant 0 : i32
    return %c0_i32, %c0_i32_0 : i32, i32
  }
  func.func @transform_3(%arg0: i32) -> (i32, i32) {
    %c0_i32 = arith.constant 0 : i32
    %c0_i32_0 = arith.constant 0 : i32
    %c0_i32_1 = arith.constant 0 : i32
    return %c0_i32, %c0_i32_0 : i32, i32
  }
  func.func @transform_4(%arg0: i32) -> (i32, i32) {
    %c0_i32 = arith.constant 0 : i32
    %c0_i32_0 = arith.constant 0 : i32
    %c0_i32_1 = arith.constant 0 : i32
    return %c0_i32, %c0_i32_0 : i32, i32
  }
  func.func @transform_5(%arg0: i32) -> (i32, i32) {
    %c0_i32 = arith.constant 0 : i32
    %c0_i32_0 = arith.constant 0 : i32
    %c0_i32_1 = arith.constant 0 : i32
    return %c0_i32, %c0_i32_0 : i32, i32
  }
  func.func @transform_6(%arg0: i32) -> (i32, i32) {
    %c0_i32 = arith.constant 0 : i32
    %c0_i32_0 = arith.constant 0 : i32
    %c0_i32_1 = arith.constant 0 : i32
    return %c0_i32, %c0_i32_0 : i32, i32
  }
  func.func @transform_7(%arg0: i32) -> (i32, i32) {
    %c0_i32 = arith.constant 0 : i32
    %c0_i32_0 = arith.constant 0 : i32
    %c0_i32_1 = arith.constant 0 : i32
    return %c0_i32, %c0_i32_0 : i32, i32
  }
  func.func @transform_8(%arg0: i32) -> (i32, i32) {
    %c0_i32 = arith.constant 0 : i32
    %c0_i32_0 = arith.constant 0 : i32
    %c0_i32_1 = arith.constant 0 : i32
    return %c0_i32, %c0_i32_0 : i32, i32
  }
  func.func @transform_9(%arg0: i32) -> (i32, i32) {
    %c0_i32 = arith.constant 0 : i32
    %c0_i32_0 = arith.constant 0 : i32
    return %arg0, %c0_i32 : i32, i32
  }
}

</mosaic_0001>

<bundles_post_ra>
// kernel: tpu_custom_call.1
= control target key start
LH: loop header
LB: loop body
LE: loop exit
PB: predicated region body
PF: predicated region fallthrough
CT: control target
= control target key end

     0   :  { %14 = vsyncpa [#allocation3], 0  ;;  %s1091_s0 = inlined_call_operand.hbm [shape: f32[8,14], index: 0, kind: input, shape index: {}]   ;;  %s1092_s1 = inlined_call_operand.hbm [shape: f32[14,224], index: 1, kind: input, shape index: {}]   ;;  %s1093_s2 = inlined_call_operand.vmem [shape: f32[1,224], index: 2, kind: input, shape index: {}]   ;;  %s1094_s3 = inlined_call_operand.hbm [shape: f32[224,224], index: 3, kind: input, shape index: {}]   ;;  %s1095_s4 = inlined_call_operand.vmem [shape: f32[1,224], index: 4, kind: input, shape index: {}]   ;;  %s1096_s5 = inlined_call_operand.hbm [shape: f32[224,256], index: 5, kind: input, shape index: {}]   ;;  %s1097_s6 = inlined_call_operand.vmem [shape: f32[1,256], index: 6, kind: input, shape index: {}]   ;;  %s1098_s7 = inlined_call_operand.vmem [shape: f32[1,256], index: 7, kind: input, shape index: {}]   ;;  %s1099_s8 = inlined_call_operand.vmem [shape: f32[1,256], index: 8, kind: input, shape index: {}]   ;;  %s1100_s9 = inlined_call_operand.hbm [shape: f32[8,256], index: 9, kind: output, shape index: {}]  }
   0x1   :  { %15 = vsyncpa [#allocation6], 0 }
   0x2   :  { %16 = vsyncpa [#allocation9], 0 }
   0x3   :  { %17 = vsyncpa [#allocation4], 0  ;;  %s914_s30 = smov [#allocation5]   ;;  %s796_s13 = scalar_lea.hbm %s1092_s1, 512 }
   0x4   :  { %s33_s10 = sshll.u32 %s914_s30, 4  ;;  %p797_p0 = scmp.ne.s32.totalorder %s1092_s1, %s796_s13  ;;  %s34_s10 = int_to_ptr.vmem [resolvable:$true] %s33_s10 }
   0x5   :  { %p800_p1 = scmp.lt.u32.totalorder %s796_s13, %s1092_s1 }
   0x7   :  { %p802_p2 = pnand %p800_p1, %p797_p0 }
   0x9   :  { %805 = shalt.err (!%p802_p2)
}
   0xa   :  { %s806_s18 = scalar_lea.vmem %s34_s10, 512  ;;  %p811_p4 = scmp.lt.s32.totalorder %s34_s10, %s34_s10 }
   0xb   :  { %p807_p3 = scmp.ne.s32.totalorder %s34_s10, %s806_s18  ;;  %p812_p5 = scmp.lt.s32.totalorder %s806_s18, %s806_s18 }
   0xd   :  { %p813_p6 = por %p812_p5, %p811_p4 }
   0xf   :  { %p814_p7 = pnand %p813_p6, %p807_p3 }
  0x11   :  { %817 = shalt.err (!%p814_p7)
}
  0x12   :  { %s915_s19 = smov 256   ;;  %s916_s20 = smov 16  }
  0x13   :  { %39 = dma.hbm_to_vmem [thread:$0]  %s1092_s1, 512, %s34_s10, [#allocation6], %s915_s19, %s915_s19, %s916_s20  }
  0x14   :  { %s917_s23 = smov [#allocation2]   ;;  %s918_s25 = smov [#allocation7]  }
  0x15   :  { %s24_s24 = sshll.u32 %s917_s23, 4  ;;  %s47_s26 = sshll.u32 %s918_s25, 4  ;;  %s25_s24 = int_to_ptr.vmem [resolvable:$true] %s24_s24  ;;  %s48_s26 = int_to_ptr.vmem [resolvable:$true] %s47_s26 }
  0x16   :  { %s818_s29 = scalar_lea.hbm %s1091_s0, 128 }
  0x17   :  { %p819_p8 = scmp.ne.s32.totalorder %s1091_s0, %s818_s29  ;;  %p822_p9 = scmp.lt.u32.totalorder %s818_s29, %s1091_s0 }
  0x19   :  { %p824_p10 = pnand %p822_p9, %p819_p8 }
  0x1b   :  { %827 = shalt.err (!%p824_p10)
}
  0x1c   :  { %s828_s1 = scalar_lea.vmem %s25_s24, 128  ;;  %p833_p12 = scmp.lt.s32.totalorder %s25_s24, %s25_s24 }
  0x1d   :  { %p829_p11 = scmp.ne.s32.totalorder %s25_s24, %s828_s1  ;;  %p834_p13 = scmp.lt.s32.totalorder %s828_s1, %s828_s1 }
  0x1f   :  { %p835_p0 = por %p834_p13, %p833_p12 }
  0x21   :  { %p836_p1 = pnand %p835_p0, %p829_p11 }
  0x23   :  { %839 = shalt.err (!%p836_p1)
}
  0x24   :  { %27 = dma.hbm_to_vmem [thread:$0]  %s1091_s0, 128, %s25_s24, [#allocation3]  }
  0x25   :  { %s840_s17 = scalar_lea.hbm %s1094_s3, 7168 }
  0x26   :  { %p841_p2 = scmp.ne.s32.totalorder %s1094_s3, %s840_s17  ;;  %p844_p3 = scmp.lt.u32.totalorder %s840_s17, %s1094_s3 }
  0x28   :  { %p846_p4 = pnand %p844_p3, %p841_p2 }
  0x2a   :  { %849 = shalt.err (!%p846_p4)
}
  0x2b   :  { %s850_s25 = scalar_lea.vmem %s48_s26, 7168  ;;  %p855_p6 = scmp.lt.s32.totalorder %s48_s26, %s48_s26 }
  0x2c   :  { %p851_p5 = scmp.ne.s32.totalorder %s48_s26, %s850_s25  ;;  %p856_p7 = scmp.lt.s32.totalorder %s850_s25, %s850_s25 }
  0x2e   :  { %p857_p8 = por %p856_p7, %p855_p6 }
  0x30   :  { %p858_p9 = pnand %p857_p8, %p851_p5 }
  0x32   :  { %861 = shalt.err (!%p858_p9)
}
  0x33   :  { %53 = dma.hbm_to_vmem [thread:$0]  %s1094_s3, 7168, %s48_s26, [#allocation6], %s915_s19, %s915_s19, %s916_s20  }
  0x34   :  { %s919_s27 = smov [#allocation8]   ;;  %s862_s11 = scalar_lea.hbm %s1096_s5, 7168 }
  0x35   :  { %s61_s28 = sshll.u32 %s919_s27, 4  ;;  %p863_p10 = scmp.ne.s32.totalorder %s1096_s5, %s862_s11  ;;  %s62_s28 = int_to_ptr.vmem [resolvable:$true] %s61_s28 }
  0x36   :  { %p866_p11 = scmp.lt.u32.totalorder %s862_s11, %s1096_s5 }
  0x38   :  { %p868_p12 = pnand %p866_p11, %p863_p10 }
  0x3a   :  { %871 = shalt.err (!%p868_p12)
}
  0x3b   :  { %s872_s14 = scalar_lea.vmem %s62_s28, 7168  ;;  %p877_p0 = scmp.lt.s32.totalorder %s62_s28, %s62_s28 }
  0x3c   :  { %p873_p13 = scmp.ne.s32.totalorder %s62_s28, %s872_s14  ;;  %p878_p1 = scmp.lt.s32.totalorder %s872_s14, %s872_s14 }
  0x3e   :  { %p879_p2 = por %p878_p1, %p877_p0 }
  0x40   :  { %p880_p3 = pnand %p879_p2, %p873_p13 }
  0x42   :  { %883 = shalt.err (!%p880_p3)
}
  0x43   :  { %67 = dma.hbm_to_vmem [thread:$0]  %s1096_s5, 7168, %s62_s28, [#allocation9], %s915_s19, %s915_s19, %s916_s20  }
  0x44   :  { %906 = dma.done.wait [#allocation3], 128  }
  0x45   :  { %907 = vsyncadd [#allocation3], 4294967168 }
  0x46   :  { %908 = dma.done.wait [#allocation6], 7680  }
  0x47   :  { %909 = vsyncadd [#allocation6], 4294959616 }
  0x48   :  { %910 = dma.done.wait [#allocation9], 7168  }
  0x49   :  { %911 = vsyncadd [#allocation9], 4294960128  ;;  %v920_v0 = vmov 0.0   ;;  %vm107_vm0 = vcmask 1045504   ;;  %vm921_vm1 = vmmov 1   ;;  %v88_v2 = vld [vmem:[#allocation5 + $0x8] sm:$0xff] }
  0x4a   :  { %178 = vmatprep.mubr.f32.mxu0 %v920_v0  ;;  %vm1030_vm2 = vmpackc.low %vm107_vm0, %vm921_vm1  ;;  %v90_v3 = vld [vmem:[#allocation5 + $0x18] sm:$0x3f]  ;;  %v87_v4 = vld [vmem:[#allocation5] sm:$0xff]  ;;  %vm103_vm3 = vcmask 113664   ;;  %vm273_vm6 = vcmask 785408  }
  0x4b   :  { %v637_v5 = vpack.c.bf16 %v90_v3, %v88_v2  ;;  %v89_v6 = vld [vmem:[#allocation5 + $0x10] sm:$0x3f]  ;;  %v206_v7 = vld [vmem:[#allocation7 + $0x8] sm:$0xff]  ;;  %v86_v9 = vld [vmem:[#allocation2] sm:$0xff] }
  0x4c   :  { %v640_v8 = vpack.c.bf16 %v89_v6, %v87_v4  ;;  %v208_v10 = vld [vmem:[#allocation7 + $0x18] sm:$0xff]  ;;  %v205_v11 = vld [vmem:[#allocation7] sm:$0xff]  ;;  %v207_v12 = vld [vmem:[#allocation7 + $0x10] sm:$0xff] }
  0x4d   :  { %639 = vmatprep.subr.msk.bf16.mxu0 %vm1030_vm2, %v637_v5  ;;  %v643_v13 = vpack.c.bf16 %v208_v10, %v206_v7  ;;  %v645_v14 = vpack.c.bf16 %v207_v12, %v205_v11  ;;  %v210_v15 = vld [vmem:[#allocation7 + $0x28] sm:$0xff]  ;;  %v212_v16 = vld [vmem:[#allocation7 + $0x38] sm:$0xff]  ;;  %v209_v17 = vld [vmem:[#allocation7 + $0x20] sm:$0xff] }
  0x4e   :  { %642 = vmatpush1.bf16.msk.msra.mxu0 %vm1030_vm2, %v640_v8  ;;  %v647_v18 = vpack.c.bf16 %v212_v16, %v210_v15  ;;  %v211_v19 = vld [vmem:[#allocation7 + $0x30] sm:$0xff]  ;;  %v214_v20 = vld [vmem:[#allocation7 + $0x48] sm:$0xff]  ;;  %v216_v21 = vld [vmem:[#allocation7 + $0x58] sm:$0xff] }
  0x4f   :  { %644 = vmatprep.subr.bf16.mxu1 %v643_v13  ;;  %v649_v22 = vpack.c.bf16 %v211_v19, %v209_v17  ;;  %v651_v23 = vpack.c.bf16 %v216_v21, %v214_v20  ;;  %v213_v24 = vld [vmem:[#allocation7 + $0x40] sm:$0xff]  ;;  %v215_v25 = vld [vmem:[#allocation7 + $0x50] sm:$0xff]  ;;  %v218_v26 = vld [vmem:[#allocation7 + $0x68] sm:$0xff] }
  0x50   :  { %646 = vmatpush1.bf16.msra.mxu1 %v645_v14  ;;  %v220_v27 = vld [vmem:[#allocation7 + $0x78] sm:$0xff]  ;;  %v653_v28 = vpack.c.bf16 %v215_v25, %v213_v24  ;;  %v217_v30 = vld [vmem:[#allocation7 + $0x60] sm:$0xff]  ;;  %v219_v31 = vld [vmem:[#allocation7 + $0x70] sm:$0xff] }
  0x51   :  { %634 = vmatmul.mubr.msk.f32.vlgmr.msra.gmra.mrb[0].mxu0 %vm103_vm3, %v86_v9  ;;  %648 = vmatprep.subr.bf16.mxu1 %v647_v18  ;;  %v655_v29 = vpack.c.bf16 %v220_v27, %v218_v26  ;;  %v657_v32 = vpack.c.bf16 %v219_v31, %v217_v30  ;;  %v222_v33 = vld [vmem:[#allocation7 + $0x88] sm:$0xff]  ;;  %v224_v34 = vld [vmem:[#allocation7 + $0x98] sm:$0xff]  ;;  %v221_v36 = vld [vmem:[#allocation7 + $0x80] sm:$0xff] }
  0x52   :  { %v659_v35 = vpack.c.bf16 %v224_v34, %v222_v33  ;;  %v223_v37 = vld [vmem:[#allocation7 + $0x90] sm:$0xff]  ;;  %v226_v39 = vld [vmem:[#allocation7 + $0xa8] sm:$0xff]  ;;  %v228_v40 = vld [vmem:[#allocation7 + $0xb8] sm:$0xff] }
  0x53   :  { %v661_v38 = vpack.c.bf16 %v223_v37, %v221_v36  ;;  %v663_v41 = vpack.c.bf16 %v228_v40, %v226_v39  ;;  %v225_v42 = vld [vmem:[#allocation7 + $0xa0] sm:$0xff]  ;;  %v227_v43 = vld [vmem:[#allocation7 + $0xb0] sm:$0xff]  ;;  %v230_v45 = vld [vmem:[#allocation7 + $0xc8] sm:$0xff] }
  0x54   :  { %650 = vmatpush1.bf16.msra.mxu1 %v649_v22  ;;  %v665_v44 = vpack.c.bf16 %v227_v43, %v225_v42  ;;  %v232_v46 = vld [vmem:[#allocation7 + $0xd8] sm:$0xff]  ;;  %v229_v48 = vld [vmem:[#allocation7 + $0xc0] sm:$0xff]  ;;  %v231_v49 = vld [vmem:[#allocation7 + $0xd0] sm:$0xff] }
  0x55   :  { %652 = vmatprep.subr.bf16.mxu1 %v651_v23  ;;  %v667_v47 = vpack.c.bf16 %v232_v46, %v230_v45  ;;  %v669_v50 = vpack.c.bf16 %v231_v49, %v229_v48  ;;  %v234_v51 = vld [vmem:[#allocation7 + $0xe8] sm:$0xff]  ;;  %v236_v52 = vld [vmem:[#allocation7 + $0xf8] sm:$0xff]  ;;  %v233_v54 = vld [vmem:[#allocation7 + $0xe0] sm:$0xff] }
  0x56   :  { %v671_v53 = vpack.c.bf16 %v236_v52, %v234_v51  ;;  %v235_v55 = vld [vmem:[#allocation7 + $0xf0] sm:$0xff]  ;;  %v238_v57 = vld [vmem:[#allocation7 + $0x108] sm:$0xff]  ;;  %v240_v58 = vld [vmem:[#allocation7 + $0x118] sm:$0xff] }
  0x57   :  { %v673_v56 = vpack.c.bf16 %v235_v55, %v233_v54  ;;  %v675_v59 = vpack.c.bf16 %v240_v58, %v238_v57  ;;  %v237_v60 = vld [vmem:[#allocation7 + $0x100] sm:$0xff]  ;;  %v239_v61 = vld [vmem:[#allocation7 + $0x110] sm:$0xff]  ;;  %v242_v63 = vld [vmem:[#allocation7 + $0x128] sm:$0xff] }
  0x58   :  { %654 = vmatpush1.bf16.msra.mxu1 %v653_v28  ;;  %v677_v62 = vpack.c.bf16 %v239_v61, %v237_v60  ;;  %v244_v0 = vld [vmem:[#allocation7 + $0x138] sm:$0xff]  ;;  %v241_v2 = vld [vmem:[#allocation7 + $0x120] sm:$0xff]  ;;  %v243_v3 = vld [vmem:[#allocation7 + $0x130] sm:$0xff] }
  0x59   :  { %656 = vmatprep.subr.bf16.mxu1 %v655_v29  ;;  %v679_v1 = vpack.c.bf16 %v244_v0, %v242_v63  ;;  %v681_v4 = vpack.c.bf16 %v243_v3, %v241_v2  ;;  %v246_v5 = vld [vmem:[#allocation7 + $0x148] sm:$0xff]  ;;  %v248_v6 = vld [vmem:[#allocation7 + $0x158] sm:$0xff]  ;;  %v245_v8 = vld [vmem:[#allocation7 + $0x140] sm:$0xff] }
  0x5a   :  { %v683_v7 = vpack.c.bf16 %v248_v6, %v246_v5  ;;  %v247_v9 = vld [vmem:[#allocation7 + $0x150] sm:$0xff]  ;;  %v250_v10 = vld [vmem:[#allocation7 + $0x168] sm:$0xff]  ;;  %v252_v12 = vld [vmem:[#allocation7 + $0x178] sm:$0xff] }
  0x5b   :  { %v685_v11 = vpack.c.bf16 %v247_v9, %v245_v8  ;;  %v249_v13 = vld [vmem:[#allocation7 + $0x160] sm:$0xff]  ;;  %v251_v14 = vld [vmem:[#allocation7 + $0x170] sm:$0xff]  ;;  %v687_v15 = vpack.c.bf16 %v252_v12, %v250_v10  ;;  %v254_v16 = vld [vmem:[#allocation7 + $0x188] sm:$0xff] }
  0x5c   :  { %658 = vmatpush1.bf16.msra.mxu1 %v657_v32  ;;  %v256_v17 = vld [vmem:[#allocation7 + $0x198] sm:$0xff]  ;;  %v689_v18 = vpack.c.bf16 %v251_v14, %v249_v13  ;;  %v253_v20 = vld [vmem:[#allocation7 + $0x180] sm:$0xff]  ;;  %v255_v21 = vld [vmem:[#allocation7 + $0x190] sm:$0xff] }
  0x5d   :  { %660 = vmatprep.subr.bf16.mxu1 %v659_v35  ;;  %v691_v19 = vpack.c.bf16 %v256_v17, %v254_v16  ;;  %v258_v22 = vld [vmem:[#allocation7 + $0x1a8] sm:$0xff]  ;;  %v260_v23 = vld [vmem:[#allocation7 + $0x1b8] sm:$0xff]  ;;  %v693_v24 = vpack.c.bf16 %v255_v21, %v253_v20  ;;  %v257_v26 = vld [vmem:[#allocation7 + $0x1a0] sm:$0xff] }
  0x5e   :  { %v695_v25 = vpack.c.bf16 %v260_v23, %v258_v22  ;;  %v259_v27 = vld [vmem:[#allocation7 + $0x1b0] sm:$0xff]  ;;  %v369_v29 = vld [vmem:[#allocation8 + $0x8] sm:$0xff]  ;;  %v371_v30 = vld [vmem:[#allocation8 + $0x18] sm:$0xff] }
  0x5f   :  { %v697_v28 = vpack.c.bf16 %v259_v27, %v257_v26  ;;  %v368_v31 = vld [vmem:[#allocation8] sm:$0xff]  ;;  %v699_v32 = vpack.c.bf16 %v371_v30, %v369_v29  ;;  %v370_v33 = vld [vmem:[#allocation8 + $0x10] sm:$0xff]  ;;  %v373_v34 = vld [vmem:[#allocation8 + $0x28] sm:$0xff] }
  0x60   :  { %662 = vmatpush1.bf16.msra.mxu1 %v661_v38  ;;  %v375_v35 = vld [vmem:[#allocation8 + $0x38] sm:$0xff]  ;;  %v701_v36 = vpack.c.bf16 %v370_v33, %v368_v31  ;;  %v372_v38 = vld [vmem:[#allocation8 + $0x20] sm:$0xff]  ;;  %v374_v39 = vld [vmem:[#allocation8 + $0x30] sm:$0xff] }
  0x61   :  { %664 = vmatprep.subr.bf16.mxu1 %v663_v41  ;;  %v703_v37 = vpack.c.bf16 %v375_v35, %v373_v34  ;;  %v377_v40 = vld [vmem:[#allocation8 + $0x48] sm:$0xff]  ;;  %700 = vmatprep.subr.bf16.mxu0 %v699_v32  ;;  %v379_v41 = vld [vmem:[#allocation8 + $0x58] sm:$0xff]  ;;  %v705_v42 = vpack.c.bf16 %v374_v39, %v372_v38  ;;  %v378_v45 = vld [vmem:[#allocation8 + $0x50] sm:$0xff] }
  0x62   :  { %702 = vmatpush1.bf16.msra.mxu0 %v701_v36  ;;  %v707_v43 = vpack.c.bf16 %v379_v41, %v377_v40  ;;  %v381_v46 = vld [vmem:[#allocation8 + $0x68] sm:$0xff]  ;;  %v382_v51 = vld [vmem:[#allocation8 + $0x70] sm:$0xff]  ;;  %v384_v21 = vld [vmem:[#allocation8 + $0x80] sm:$0xff] }
  0x63   :  { %704 = vmatprep.subr.bf16.mxu0 %v703_v37  ;;  %v386_v22 = vld [vmem:[#allocation8 + $0x90] sm:$0xff]  ;;  %v388_v27 = vld [vmem:[#allocation8 + $0xa0] sm:$0xff]  ;;  %v393_v30 = vld [vmem:[#allocation8 + $0xc8] sm:$0xff] }
  0x64   :  { %666 = vmatpush1.bf16.msra.mxu1 %v665_v44  ;;  %v376_v44 = vld [vmem:[#allocation8 + $0x40] sm:$0xff]  ;;  %v717_v23 = vpack.c.bf16 %v386_v22, %v384_v21  ;;  %v395_v31 = vld [vmem:[#allocation8 + $0xd8] sm:$0xff]  ;;  %v394_v34 = vld [vmem:[#allocation8 + $0xd0] sm:$0xff] }
  0x65   :  { %668 = vmatprep.subr.bf16.mxu1 %v667_v47  ;;  %v383_v47 = vld [vmem:[#allocation8 + $0x78] sm:$0xff]  ;;  %v709_v48 = vpack.c.bf16 %v378_v45, %v376_v44  ;;  %v723_v32 = vpack.c.bf16 %v395_v31, %v393_v30  ;;  %v392_v33 = vld [vmem:[#allocation8 + $0xc0] sm:$0xff]  ;;  %v397_v36 = vld [vmem:[#allocation8 + $0xe8] sm:$0xff] }
  0x66   :  { %706 = vmatpush1.bf16.msra.mxu0 %v705_v42  ;;  %v711_v49 = vpack.c.bf16 %v383_v47, %v381_v46  ;;  %v725_v35 = vpack.c.bf16 %v394_v34, %v392_v33  ;;  %v399_v37 = vld [vmem:[#allocation8 + $0xf8] sm:$0xff]  ;;  %v396_v39 = vld [vmem:[#allocation8 + $0xe0] sm:$0xff]  ;;  %v398_v40 = vld [vmem:[#allocation8 + $0xf0] sm:$0xff] }
  0x67   :  { %708 = vmatprep.subr.bf16.mxu0 %v707_v43  ;;  %v727_v38 = vpack.c.bf16 %v399_v37, %v397_v36  ;;  %v729_v41 = vpack.c.bf16 %v398_v40, %v396_v39  ;;  %v401_v42 = vld [vmem:[#allocation8 + $0x108] sm:$0xff]  ;;  %v403_v43 = vld [vmem:[#allocation8 + $0x118] sm:$0xff]  ;;  %v400_v45 = vld [vmem:[#allocation8 + $0x100] sm:$0xff] }
  0x68   :  { %670 = vmatpush1.bf16.msra.mxu1 %v669_v50  ;;  %v380_v50 = vld [vmem:[#allocation8 + $0x60] sm:$0xff]  ;;  %v731_v44 = vpack.c.bf16 %v403_v43, %v401_v42  ;;  %v402_v46 = vld [vmem:[#allocation8 + $0x110] sm:$0xff]  ;;  %v424_v42 = vld [vmem:[%s1097_s6] sm:$0x3] }
  0x69   :  { %672 = vmatprep.subr.bf16.mxu1 %v671_v53  ;;  %v713_v52 = vpack.c.bf16 %v382_v51, %v380_v50  ;;  %v93_v53 = vlaneseq  ;;  %v733_v47 = vpack.c.bf16 %v402_v46, %v400_v45  ;;  %v404_v51 = vld [vmem:[#allocation8 + $0x120] sm:$0xff]  ;;  %v510_v43 = vld [vmem:[%s1099_s8] sm:$0x3] }
  0x6a   :  { %710 = vmatpush1.bf16.msra.mxu0 %v709_v48  ;;  %v405_v48 = vld [vmem:[#allocation8 + $0x128] sm:$0xff] }
  0x6b   :  { %712 = vmatprep.subr.bf16.mxu0 %v711_v49  ;;  %v94_v54 = vshrl.u32 %v93_v53, 7  ;;  %v407_v49 = vld [vmem:[#allocation8 + $0x138] sm:$0xff] }
  0x6c   :  { %674 = vmatpush1.bf16.msra.mxu1 %v673_v56  ;;  %v91_v56 = vld [vmem:[%s1093_s2] sm:$0x3]  ;;  %v735_v50 = vpack.c.bf16 %v407_v49, %v405_v48 }
  0x6d   :  { %676 = vmatprep.subr.bf16.mxu1 %v675_v59  ;;  %v1039_v55 = vsub.s32 0, %v94_v54  ;;  %v1044_v57 = vsub.s32 1, %v94_v54 }
  0x6e   :  { %714 = vmatpush1.bf16.msra.mxu0 %v713_v52  ;;  %v406_v52 = vld [vmem:[#allocation8 + $0x130] sm:$0xff] }
  0x6f   :  { %v96_v58 = vrot.slane %v91_v56, %v1039_v55  ;;  %v100_v59 = vrot.slane %v91_v56, %v1044_v57  ;;  %v737_v54 = vpack.c.bf16 %v406_v52, %v404_v51  ;;  %v409_v56 = vld [vmem:[#allocation8 + $0x148] sm:$0xff]  ;;  %v433_v45 = vrot.slane %v424_v42, %v1044_v57 }
  0x70   :  { %678 = vmatpush1.bf16.msra.mxu1 %v677_v62  ;;  %v516_v46 = vrot.slane %v510_v43, %v1039_v55  ;;  %v520_v48 = vrot.slane %v510_v43, %v1044_v57 }
  0x71   :  { %680 = vmatprep.subr.bf16.mxu1 %v679_v1 }
  0x74   :  { %682 = vmatpush1.bf16.msra.mxu1 %v681_v4 }
  0x75   :  { %684 = vmatprep.subr.bf16.mxu1 %v683_v7 }
  0x78   :  { %686 = vmatpush1.bf16.msra.mxu1 %v685_v11 }
  0x79   :  { %688 = vmatprep.subr.bf16.mxu1 %v687_v15 }
  0x7c   :  { %690 = vmatpush1.bf16.msra.mxu1 %v689_v18  ;;  %v385_v18 = vld [vmem:[#allocation8 + $0x88] sm:$0xff] }
  0x7d   :  { %692 = vmatprep.subr.bf16.mxu1 %v691_v19  ;;  %v387_v19 = vld [vmem:[#allocation8 + $0x98] sm:$0xff] }
  0x7e   :  { %v715_v20 = vpack.c.bf16 %v387_v19, %v385_v18 }
  0x80   :  { %694 = vmatpush1.bf16.msra.mxu1 %v693_v24  ;;  %716 = vmatprep.subr.bf16.mxu0 %v715_v20  ;;  %v389_v24 = vld [vmem:[#allocation8 + $0xa8] sm:$0xff] }
  0x81   :  { %696 = vmatprep.subr.bf16.mxu1 %v695_v25  ;;  %718 = vmatpush1.bf16.msra.mxu0 %v717_v23  ;;  %v391_v25 = vld [vmem:[#allocation8 + $0xb8] sm:$0xff] }
  0x82   :  { %v719_v26 = vpack.c.bf16 %v391_v25, %v389_v24 }
  0x84   :  { %698 = vmatpush1.bf16.msra.mxu1 %v697_v28  ;;  %v390_v28 = vld [vmem:[#allocation8 + $0xb0] sm:$0xff]  ;;  %720 = vmatprep.subr.bf16.mxu0 %v719_v26 }
  0x85   :  { %v721_v29 = vpack.c.bf16 %v390_v28, %v388_v27 }
  0x87   :  { %722 = vmatpush1.bf16.msra.mxu0 %v721_v29 }
  0x88   :  { %724 = vmatprep.subr.bf16.mxu0 %v723_v32 }
  0x8b   :  { %726 = vmatpush1.bf16.msra.mxu0 %v725_v35 }
  0x8c   :  { %728 = vmatprep.subr.bf16.mxu0 %v727_v38 }
  0x8f   :  { %730 = vmatpush1.bf16.msra.mxu0 %v729_v41 }
  0x90   :  { %732 = vmatprep.subr.bf16.mxu0 %v731_v44  ;;  %v429_v44 = vrot.slane %v424_v42, %v1039_v55 }
  0x93   :  { %734 = vmatpush1.bf16.msra.mxu0 %v733_v47 }
  0x94   :  { %736 = vmatprep.subr.bf16.mxu0 %v735_v50 }
  0x97   :  { %738 = vmatpush1.bf16.msra.mxu0 %v737_v54 }
 0x124   :  { %v180_v60 = vpop.f32.mrb[0].mxu0 }
 0x125   :  { %v181_v61 = vadd.f32 %v180_v60, %v96_v58  ;;  %v182_v62 = vpop.f32.mrb[1].mxu0  ;;  %v411_v58 = vld [vmem:[#allocation8 + $0x158] sm:$0xff]  ;;  %v408_v60 = vld [vmem:[#allocation8 + $0x140] sm:$0xff] }
 0x126   :  { %v183_v63 = vadd.f32 %v182_v62, %v100_v59  ;;  %v739_v59 = vpack.c.bf16 %v411_v58, %v409_v56 }
 0x127   :  { %v185_v0 = vand.u32 2147483647, %v181_v61  ;;  %vm197_vm4 = vcmp.ge.f32.partialorder %v181_v61, 0.0 }
 0x128   :  { %v186_v1 = vand.u32 2147483647, %v183_v63  ;;  %vm198_vm5 = vcmp.ge.f32.partialorder %v183_v63, 0.0  ;;  %740 = vmatprep.subr.bf16.mxu0 %v739_v59 }
 0x129   :  { %v187_v2 = vsub.f32 0.0, %v185_v0  ;;  %v415_v0 = vld [vmem:[#allocation8 + $0x178] sm:$0xff] }
 0x12a   :  { %v188_v3 = vsub.f32 0.0, %v186_v1 }
 0x12b   :  { %v189_v4 = vmul.f32 1.442695, %v187_v2  ;;  %v412_v2 = vld [vmem:[#allocation8 + $0x160] sm:$0xff] }
 0x12c   :  { %v191_v5 = vmul.f32 1.442695, %v188_v3  ;;  %v414_v3 = vld [vmem:[#allocation8 + $0x170] sm:$0xff] }
 0x12d   :  { %764 = vpow2.f32 %v189_v4  ;;  %v745_v4 = vpack.c.bf16 %v414_v3, %v412_v2 }
 0x12e   :  { %766 = vpow2.f32 %v191_v5  ;;  %v417_v5 = vld [vmem:[#allocation8 + $0x188] sm:$0xff] }
 0x137   :  { %v765_v6 = vpop.eup %764 }
 0x138   :  { %v767_v7 = vpop.eup %766  ;;  %v193_v8 = vadd.f32 1.0, %v765_v6 }
 0x139   :  { %v194_v9 = vadd.f32 1.0, %v767_v7 }
 0x13a   :  { %768 = vrcp.f32 %v193_v8  ;;  %v416_v8 = vld [vmem:[#allocation8 + $0x180] sm:$0xff] }
 0x13b   :  { %770 = vrcp.f32 %v194_v9  ;;  %v418_v9 = vld [vmem:[#allocation8 + $0x190] sm:$0xff] }
 0x144   :  { %v769_v10 = vpop.eup %768 }
 0x145   :  { %v771_v11 = vpop.eup %770  ;;  %v199_v12 = vmul.f32 %v769_v10, %v765_v6  ;;  %v419_v6 = vld [vmem:[#allocation8 + $0x198] sm:$0xff] }
 0x146   :  { %v200_v13 = vmul.f32 %v771_v11, %v767_v7  ;;  %v747_v7 = vpack.c.bf16 %v419_v6, %v417_v5 }
 0x147   :  { %v201_v14 = vsel %vm197_vm4, %v769_v10, %v199_v12  ;;  %v749_v10 = vpack.c.bf16 %v418_v9, %v416_v8  ;;  %v423_v12 = vld [vmem:[#allocation8 + $0x1b8] sm:$0xff] }
 0x148   :  { %v202_v15 = vsel %vm198_vm5, %v771_v11, %v200_v13  ;;  %v203_v17 = vmul.f32 %v201_v14, %v181_v61  ;;  %v410_v61 = vld [vmem:[#allocation8 + $0x150] sm:$0xff]  ;;  %v421_v11 = vld [vmem:[#allocation8 + $0x1a8] sm:$0xff]  ;;  %v420_v14 = vld [vmem:[#allocation8 + $0x1a0] sm:$0xff] }
 0x149   :  { %v204_v16 = vmul.f32 %v202_v15, %v183_v63  ;;  %v741_v62 = vpack.c.bf16 %v410_v61, %v408_v60  ;;  %v413_v63 = vld [vmem:[#allocation8 + $0x168] sm:$0xff]  ;;  %v751_v13 = vpack.c.bf16 %v423_v12, %v421_v11  ;;  %v422_v15 = vld [vmem:[#allocation8 + $0x1b0] sm:$0xff]  ;;  %v511_v11 = vld [vmem:[%s1098_s7] sm:$0x3]  ;;  %s922_s7 = smov [#allocation10]  }
 0x14a   :  { %v743_v1 = vpack.c.bf16 %v415_v0, %v413_v63  ;;  %s621_s18 = sshll.u32 %s922_s7, 4  ;;  %s622_s18 = int_to_ptr.vmem [resolvable:$true] %s621_s18 }
 0x14b   :  { %635 = vmatprep.mubr.msk.f32.mxu1 %vm273_vm6, %v204_v16  ;;  %742 = vmatpush1.bf16.msra.mxu0 %v741_v62  ;;  %v753_v16 = vpack.c.bf16 %v422_v15, %v420_v14  ;;  %s884_s21 = scalar_lea.vmem %s622_s18, 256  ;;  %p889_p5 = scmp.lt.s32.totalorder %s622_s18, %s622_s18 }
 0x14c   :  { %342 = vmatmul.mubr.f32.vlgmr.msra.gmra.mrb[0].mxu1 %v203_v17  ;;  %744 = vmatprep.subr.bf16.mxu0 %v743_v1  ;;  %v261_v17 = vld [vmem:[%s1095_s4] sm:$0x3]  ;;  %p885_p4 = scmp.ne.s32.totalorder %s622_s18, %s884_s21  ;;  %p890_p6 = scmp.lt.s32.totalorder %s884_s21, %s884_s21 }
 0x14d   :  { %v266_v18 = vrot.slane %v261_v17, %v1039_v55  ;;  %v270_v19 = vrot.slane %v261_v17, %v1044_v57 }
 0x14e   :  { %p891_p7 = por %p890_p6, %p889_p5 }
 0x14f   :  { %746 = vmatpush1.bf16.msra.mxu0 %v745_v4 }
 0x150   :  { %748 = vmatprep.subr.bf16.mxu0 %v747_v7  ;;  %p892_p8 = pnand %p891_p7, %p885_p4 }
 0x153   :  { %750 = vmatpush1.bf16.msra.mxu0 %v749_v10 }
 0x154   :  { %752 = vmatprep.subr.bf16.mxu0 %v751_v13 }
 0x157   :  { %754 = vmatpush1.bf16.msra.mxu0 %v753_v16 }
 0x21f   :  { %v343_v20 = vpop.f32.mrb[0].mxu1 }
 0x220   :  { %v344_v21 = vadd.f32 %v343_v20, %v266_v18  ;;  %v345_v22 = vpop.f32.mrb[1].mxu1  ;;  %v561_v20 = vrot.slane %v511_v11, %v1039_v55 }
 0x221   :  { %v346_v23 = vadd.f32 %v345_v22, %v270_v19 }
 0x222   :  { %v348_v24 = vand.u32 2147483647, %v344_v21  ;;  %vm360_vm7 = vcmp.ge.f32.partialorder %v344_v21, 0.0 }
 0x223   :  { %v349_v25 = vand.u32 2147483647, %v346_v23  ;;  %vm361_vm8 = vcmp.ge.f32.partialorder %v346_v23, 0.0 }
 0x224   :  { %v350_v26 = vsub.f32 0.0, %v348_v24 }
 0x225   :  { %v351_v27 = vsub.f32 0.0, %v349_v25 }
 0x226   :  { %v352_v28 = vmul.f32 1.442695, %v350_v26 }
 0x227   :  { %v354_v29 = vmul.f32 1.442695, %v351_v27 }
 0x228   :  { %772 = vpow2.f32 %v352_v28 }
 0x229   :  { %774 = vpow2.f32 %v354_v29 }
 0x232   :  { %v773_v30 = vpop.eup %772 }
 0x233   :  { %v775_v31 = vpop.eup %774  ;;  %v356_v32 = vadd.f32 1.0, %v773_v30 }
 0x234   :  { %v357_v33 = vadd.f32 1.0, %v775_v31 }
 0x235   :  { %776 = vrcp.f32 %v356_v32 }
 0x236   :  { %778 = vrcp.f32 %v357_v33 }
 0x23f   :  { %v777_v34 = vpop.eup %776 }
 0x240   :  { %v779_v35 = vpop.eup %778  ;;  %v362_v36 = vmul.f32 %v777_v34, %v773_v30 }
 0x241   :  { %v363_v37 = vmul.f32 %v779_v35, %v775_v31 }
 0x242   :  { %v364_v38 = vsel %vm360_vm7, %v777_v34, %v362_v36 }
 0x243   :  { %v365_v39 = vsel %vm361_vm8, %v779_v35, %v363_v37  ;;  %v366_v41 = vmul.f32 %v364_v38, %v344_v21 }
 0x244   :  { %v367_v40 = vmul.f32 %v365_v39, %v346_v23  ;;  %v565_v23 = vrot.slane %v511_v11, %v1044_v57  ;;  %v603_v39 = vand.u32 127, %v93_v53 }
 0x246   :  { %636 = vmatprep.mubr.msk.f32.mxu0 %vm273_vm6, %v367_v40  ;;  %vm605_vm13 = vcmp.ge.s32.totalorder %v603_v39, 84 }
 0x247   :  { %504 = vmatmul.mubr.f32.vlgmr.msra.gmra.mrb[2].mxu0 %v366_v41 }
 0x31a   :  { %v505_v47 = vpop.f32.mrb[2].mxu0 }
 0x31b   :  { %v1065_v49 = vadd.f32 %v505_v47, %v429_v44  ;;  %v507_v50 = vpop.f32.mrb[3].mxu0  ;;  %v604_v47 = vadd.s32 128, %v603_v39 }
 0x31c   :  { %v1067_v51 = vadd.f32 %v507_v50, %v433_v45 }
 0x31d   :  { %v523_v52 = vsub.f32 %v516_v46, %v1065_v49  ;;  %vm608_vm14 = vcmp.lt.s32.totalorder %v604_v47, 168 }
 0x31e   :  { %v524_v54 = vsub.f32 %v520_v48, %v1067_v51 }
 0x31f   :  { %v527_v56 = vand.u32 2147483647, %v523_v52  ;;  %v525_v14 = vmax.f32 %v523_v52, 0.0 }
 0x320   :  { %v528_v58 = vand.u32 2147483647, %v524_v54  ;;  %v526_v18 = vmax.f32 %v524_v54, 0.0 }
 0x321   :  { %v529_v59 = vsub.f32 0.0, %v527_v56 }
 0x322   :  { %v530_v60 = vsub.f32 0.0, %v528_v58 }
 0x323   :  { %v531_v61 = vmul.f32 1.442695, %v529_v59 }
 0x324   :  { %v533_v62 = vmul.f32 1.442695, %v530_v60 }
 0x325   :  { %780 = vpow2.f32 %v531_v61 }
 0x326   :  { %782 = vpow2.f32 %v533_v62 }
 0x32f   :  { %v781_v63 = vpop.eup %780 }
 0x330   :  { %v783_v0 = vpop.eup %782  ;;  %v535_v1 = vadd.f32 1.0, %v781_v63  ;;  %v538_v3 = vmul.f32 -0.5, %v781_v63  ;;  %v541_v6 = vand.u32 2147483647, %v781_v63 }
 0x331   :  { %v544_v2 = vadd.f32 1.0, %v783_v0  ;;  %v547_v4 = vmul.f32 -0.5, %v783_v0  ;;  %v550_v8 = vand.u32 2147483647, %v783_v0 }
 0x332   :  { %784 = vlog2.f32 %v535_v1  ;;  %v539_v5 = vadd.f32 1.0, %v538_v3  ;;  %vm542_vm9 = vcmp.lt.f32.partialorder %v541_v6, 0.0004427343 }
 0x333   :  { %786 = vlog2.f32 %v544_v2  ;;  %v548_v7 = vadd.f32 1.0, %v547_v4  ;;  %vm551_vm10 = vcmp.lt.f32.partialorder %v550_v8, 0.0004427343 }
 0x334   :  { %v540_v13 = vmul.f32 %v781_v63, %v539_v5 }
 0x335   :  { %v549_v16 = vmul.f32 %v783_v0, %v548_v7 }
 0x33c   :  { %v785_v9 = vpop.eup %784 }
 0x33d   :  { %v787_v10 = vpop.eup %786  ;;  %v537_v12 = vmul.f32 0.6931472, %v785_v9 }
 0x33e   :  { %v546_v15 = vmul.f32 0.6931472, %v787_v10 }
 0x33f   :  { %v543_v17 = vsel %vm542_vm9, %v540_v13, %v537_v12 }
 0x340   :  { %v553_v19 = vadd.f32 %v543_v17, %v525_v14  ;;  %v552_v21 = vsel %vm551_vm10, %v549_v16, %v546_v15 }
 0x341   :  { %v554_v22 = vadd.f32 %v552_v21, %v526_v18 }
 0x342   :  { %v555_v24 = vsub.f32 %v516_v46, %v553_v19 }
 0x343   :  { %v556_v25 = vsub.f32 %v520_v48, %v554_v22 }
 0x344   :  { %v568_v26 = vsub.f32 %v555_v24, %v561_v20 }
 0x345   :  { %v569_v27 = vsub.f32 %v556_v25, %v565_v23 }
 0x346   :  { %v572_v28 = vand.u32 2147483647, %v568_v26  ;;  %v570_v48 = vmax.f32 %v568_v26, 0.0 }
 0x347   :  { %v573_v29 = vand.u32 2147483647, %v569_v27  ;;  %v571_v54 = vmax.f32 %v569_v27, 0.0 }
 0x348   :  { %v574_v30 = vsub.f32 0.0, %v572_v28 }
 0x349   :  { %v575_v31 = vsub.f32 0.0, %v573_v29 }
 0x34a   :  { %v576_v32 = vmul.f32 1.442695, %v574_v30 }
 0x34b   :  { %v578_v33 = vmul.f32 1.442695, %v575_v31 }
 0x34c   :  { %788 = vpow2.f32 %v576_v32 }
 0x34d   :  { %790 = vpow2.f32 %v578_v33 }
 0x356   :  { %v789_v34 = vpop.eup %788 }
 0x357   :  { %v791_v35 = vpop.eup %790  ;;  %v580_v36 = vadd.f32 1.0, %v789_v34  ;;  %v583_v37 = vmul.f32 -0.5, %v789_v34  ;;  %v586_v40 = vand.u32 2147483647, %v789_v34 }
 0x358   :  { %v589_v55 = vadd.f32 1.0, %v791_v35  ;;  %v592_v57 = vmul.f32 -0.5, %v791_v35  ;;  %v595_v42 = vand.u32 2147483647, %v791_v35 }
 0x359   :  { %792 = vlog2.f32 %v580_v36  ;;  %v584_v38 = vadd.f32 1.0, %v583_v37  ;;  %vm587_vm11 = vcmp.lt.f32.partialorder %v586_v40, 0.0004427343 }
 0x35a   :  { %794 = vlog2.f32 %v589_v55  ;;  %v593_v41 = vadd.f32 1.0, %v592_v57  ;;  %vm596_vm12 = vcmp.lt.f32.partialorder %v595_v42, 0.0004427343 }
 0x35b   :  { %v585_v46 = vmul.f32 %v789_v34, %v584_v38 }
 0x35c   :  { %v594_v52 = vmul.f32 %v791_v35, %v593_v41 }
 0x363   :  { %v793_v43 = vpop.eup %792 }
 0x364   :  { %v795_v44 = vpop.eup %794  ;;  %v582_v45 = vmul.f32 0.6931472, %v793_v43 }
 0x365   :  { %v591_v50 = vmul.f32 0.6931472, %v795_v44 }
 0x366   :  { %v588_v56 = vsel %vm587_vm11, %v585_v46, %v582_v45 }
 0x367   :  { %v597_v58 = vsel %vm596_vm12, %v594_v52, %v591_v50  ;;  %v598_v59 = vadd.f32 %v588_v56, %v570_v48 }
 0x368   :  { %v599_v60 = vadd.f32 %v597_v58, %v571_v54 }
 0x369   :  { %v600_v53 = vadd.f32 %v598_v59, %v561_v20 }
 0x36a   :  { %v601_v61 = vadd.f32 %v599_v60, %v565_v23 }
 0x36b   :  { %v611_v62 = vsel %vm605_vm13, %v600_v53, %v1065_v49 }
 0x36c   :  { %v612_v63 = vsel %vm608_vm14, %v601_v61, %v1067_v51  ;;  %613 = vst [vmem:[#allocation10] sm:$0xff] %v611_v62 }
 0x36d   :  { %614 = vst [vmem:[#allocation10 + $0x8] sm:$0xff] %v612_v63 }
 0x36e   :  { %895 = shalt.err (!%p892_p8)
}
 0x36f   :  { %s896_s25 = scalar_lea.hbm %s1100_s9, 256 }
 0x370   :  { %p897_p9 = scmp.ne.s32.totalorder %s1100_s9, %s896_s25  ;;  %p900_p10 = scmp.lt.u32.totalorder %s896_s25, %s1100_s9 }
 0x372   :  { %p902_p11 = pnand %p900_p10, %p897_p9 }
 0x374   :  { %905 = shalt.err (!%p902_p11)
}
 0x375   :  { %624 = dma.vmem_to_hbm [thread:$0]  %s622_s18, 256, %s1100_s9, [#allocation4]  }
 0x376   :  { %912 = dma.done.wait [#allocation4], 256  }
 0x377   :  { %913 = vsyncadd [#allocation4], 4294967040 }
 0x378   :  { %628 = vsyncpa [#allocation3], 1 }
 0x379   :  { %629 = vsyncpa [#allocation6], 1 }
 0x37a   :  { %630 = vsyncpa [#allocation9], 1 }
 0x37b   :  { %631 = vsyncpa [#allocation4], 1 }

</bundles_post_ra>
